<compile_context>
chip_gen: v5e
topology: v5e:2x2
jax: 0.10.0
libtpu: 0.0.40
codegen_flags: <defaults>
</compile_context>

<pallas_src>
import functools

import jax
import jax.numpy as jnp
from jax.experimental import pallas as pl
from jax.experimental.pallas import tpu as pltpu

V_TH = 1.0


def _round_up(x, m):
    return (x + m - 1) // m * m


def _vmem_cap_bytes():
    """Generation-aware scoped-VMEM ceiling: 75% of physical per-core VMEM."""
    try:
        phys = int(pltpu.get_tpu_info().vmem_capacity_bytes)
    except Exception:
        phys = 64 << 20  # conservative fallback (v7x per-TC size)
    return (phys * 3) // 4


def _pick_tn(out_pad):
    """Largest OUT tile that still yields >=2 grid tiles (keeps both v7x TCs busy)."""
    for tn in (512, 256, 128):
        if out_pad % tn == 0 and out_pad // tn >= 2:
            return tn
    return 128


@functools.lru_cache(maxsize=None)
def _make_seq_kernel(alpha):
    """Kernel body with alpha-derived constants baked in (leak path = one VPU multiply)."""
    if alpha is not None and alpha == 0.0:
        raise ValueError("alpha (LeakyReLU negative_slope) must be non-zero or None.")
    inv_alpha = None if alpha is None else 1.0 / alpha
    neg_th = None if alpha is None else -V_TH / alpha

    def kernel(x_ref, wt_ref, b_ref, v0_ref, spk_ref, vout_ref, v_acc):
        t = pl.program_id(1)

        @pl.when(t == 0)
        def _():
            v_acc[...] = v0_ref[...]

        # Spikes are exactly {-1, 0, +1}: the cast to the weight dtype is exact.
        x = x_ref[0].astype(wt_ref.dtype)
        z = jnp.dot(x, wt_ref[...], preferred_element_type=jnp.float32) + b_ref[...]
        v = v_acc[...] + z
        plus = (v >= V_TH).astype(jnp.float32)
        if alpha is not None:
            minus = (v <= neg_th).astype(jnp.float32)
            v_acc[...] = v - plus + minus * inv_alpha
            spk = plus - minus
        else:
            v_acc[...] = v - plus
            spk = plus
        spk_ref[0] = spk.astype(spk_ref.dtype)

        @pl.when(t == pl.num_programs(1) - 1)
        def _():
            vout_ref[...] = v_acc[...]

    return kernel


def prepare_spiking_dense_params(weight, bias, weight_dtype=jnp.float32):
    """One-time parameter prep (hoisted out of the per-call path).

    weight: (OUT, IN) f32 (PyTorch nn.Linear layout); bias: (OUT,) f32.
    Returns wt_pad (IN, OUT_pad), b_pad (1, OUT_pad) f32, OUT_pad.
    """
    OUT, IN = weight.shape
    OUT_pad = _round_up(OUT, 128)
    wt_pad = jnp.zeros((IN, OUT_pad), weight_dtype).at[:, :OUT].set(
        weight.T.astype(weight_dtype))
    b_pad = jnp.zeros((1, OUT_pad), jnp.float32).at[:, :OUT].set(
        bias.astype(jnp.float32))
    return wt_pad, b_pad, OUT_pad


def init_spiking_dense_state(batch_size, out_pad, init_mem=0.0):
    """reset(): padded membrane potential (f32) and spike output (bf16, exact) buffers."""
    b_pad = _round_up(batch_size, 16)
    v = jnp.full((b_pad, out_pad), init_mem, jnp.float32)
    out = jnp.zeros((b_pad, out_pad), jnp.bfloat16)
    return v, out


@functools.partial(jax.jit, static_argnames=("alpha",))
def spiking_dense_forward_seq(x_seq, wt, b, v, out, *, alpha=0.01):
    """Run T SpikingDense timesteps in ONE pallas_call.

    Args:
      x_seq: (T, B, IN) input spikes (values in {-1, 0, +1}), any float dtype, or
             already padded (T, B_pad, IN) bf16 from a previous spiking layer.
      wt:    (IN, OUT_pad) pre-transposed / padded weight (prepare_spiking_dense_params).
      b:     (1, OUT_pad)  f32 padded bias.
      v:     (B_pad, OUT_pad) f32 membrane state.
      out:   (B_pad, OUT_pad) bf16 previous spike-output state.

    Returns:
      prev_seq (T, B_pad, OUT_pad) bf16  -- the module's return value at each step
      v_new    (B_pad, OUT_pad)    f32   -- final membrane state
      out_new  (B_pad, OUT_pad)    bf16  -- final spike-output state
      spikecount_delta (scalar f32)      -- sum(|x|) over the whole train
    """
    T, B, IN = x_seq.shape
    B_pad, OUT_pad = v.shape

    # spikecount contribution: one XLA reduction over the whole spike train.
    sc = jnp.sum(jnp.abs(x_seq.astype(jnp.float32)))

    # One pad + cast for the whole train; skipped when fed a padded bf16 activation.
    if B == B_pad and x_seq.dtype == jnp.bfloat16:
        x_p = x_seq
    else:
        x_p = jnp.zeros((T, B_pad, IN), jnp.bfloat16).at[:, :B, :].set(
            x_seq.astype(jnp.bfloat16))

    TN = _pick_tn(OUT_pad)
    grid = (OUT_pad // TN, T)  # t last -> innermost; weight/v tile resident across t

    wbytes = jnp.dtype(wt.dtype).itemsize
    vmem_est = (
        2 * (B_pad * IN * 2)        # x_t tile, double-buffered (bf16)
        + 2 * (IN * TN * wbytes)    # weight column tile (revisited per OUT tile)
        + 2 * (TN * 4)              # bias tile
        + 2 * (B_pad * TN * 4)      # initial-v input tile
        + 2 * (B_pad * TN * 2)      # per-step spike output tile, double-buffered (bf16)
        + 2 * (B_pad * TN * 4)      # final-v output tile
        + B_pad * TN * 4            # v accumulator scratch
    )
    vmem_limit = int(min(max(vmem_est + (4 << 20), 8 << 20), _vmem_cap_bytes()))

    kernel = _make_seq_kernel(alpha)

    spikes_seq, v_new = pl.pallas_call(
        kernel,
        out_shape=(
            jax.ShapeDtypeStruct((T, B_pad, OUT_pad), jnp.bfloat16),  # out at each step
            jax.ShapeDtypeStruct((B_pad, OUT_pad), jnp.float32),      # final v
        ),
        grid=grid,
        in_specs=[
            pl.BlockSpec((1, B_pad, IN), lambda j, t: (t, 0, 0)),   # x_t (full B, IN)
            pl.BlockSpec((IN, TN),       lambda j, t: (0, j)),      # weight tile (t-invariant)
            pl.BlockSpec((1, TN),        lambda j, t: (0, j)),      # bias tile
            pl.BlockSpec((B_pad, TN),    lambda j, t: (0, j)),      # initial v tile
        ],
        out_specs=(
            pl.BlockSpec((1, B_pad, TN), lambda j, t: (t, 0, j)),   # per-step spikes
            pl.BlockSpec((B_pad, TN),    lambda j, t: (0, j)),      # final v
        ),
        scratch_shapes=[pltpu.VMEM((B_pad, TN), jnp.float32)],      # v resident across t
        input_output_aliases={3: 1},                                # v updated in place
        compiler_params=pltpu.CompilerParams(
            dimension_semantics=("parallel", "arbitrary"),
            vmem_limit_bytes=vmem_limit,
        ),
    )(x_p, wt, b, v)

    # prev_t = out_{t-1}; prev_0 is the incoming state. No kernel copy needed.
    prev_seq = jnp.concatenate([out[None], spikes_seq[:-1]], axis=0)
    out_new = spikes_seq[-1]
    return prev_seq, v_new, out_new, sc


def spiking_dense_forward(x, wt, b, v, out, *, alpha=0.01):
    """Single-timestep convenience wrapper (matches SpikingDense.forward one call)."""
    prev_seq, v_new, out_new, sc = spiking_dense_forward_seq(
        x[None], wt, b, v, out, alpha=alpha)
    return prev_seq[0], v_new, out_new, sc


def _reference_forward(x, weight, bias, v, out, alpha=0.01):
    """Pure-JAX fp32 reference of one step (matches the PyTorch module semantics)."""
    sc = jnp.sum(jnp.abs(x))
    prev = out
    z = jnp.dot(x, weight.T, precision=jax.lax.Precision.HIGHEST) + bias
    v = v + z
    plus = (v >= V_TH).astype(jnp.float32)
    if alpha is not None:
        minus = (v <= -V_TH / alpha).astype(jnp.float32)
        v_new = v - plus + minus / alpha
        out_new = plus - minus
    else:
        v_new = v - plus
        out_new = plus
    return prev, v_new, out_new, sc


if __name__ == "__main__":
    key = jax.random.PRNGKey(0)
    k_x, k_w, k_b = jax.random.split(key, 3)

    B, IN, OUT, T = 4, 64, 200, 6   # batch=4, in_features=64, out_features=200, 6 steps
    alpha = 0.01                    # LeakyReLU negative_slope
    init_mem = 0.0

    # Deterministic synthetic parameters (nn.Linear shapes), scaled so spikes fire.
    weight = 0.15 * jax.random.normal(k_w, (OUT, IN), dtype=jnp.float32)
    bias = 0.05 * jax.random.normal(k_b, (OUT,), dtype=jnp.float32)

    # Bipolar input spike train in {-1, 0, +1}.
    x_seq = jax.random.randint(k_x, (T, B, IN), -1, 2).astype(jnp.float32)

    # One-time prep + reset().
    wt_pad, b_pad, OUT_pad = prepare_spiking_dense_params(weight, bias)
    v_state, out_state = init_spiking_dense_state(B, OUT_pad, init_mem)

    # --- fused multi-timestep call (one pallas_call for all T steps) ---
    prev_seq, v_state, out_state, sc = spiking_dense_forward_seq(
        x_seq, wt_pad, b_pad, v_state, out_state, alpha=alpha)
    jax.block_until_ready((prev_seq, v_state, out_state, sc))

    # fp32 reference, stepped.
    v_ref = jnp.full((B, OUT), init_mem, jnp.float32)
    out_ref = jnp.zeros((B, OUT), jnp.float32)
    sc_ref = 0.0
    for t in range(T):
        prev_r, v_ref, out_ref, sc_t = _reference_forward(
            x_seq[t], weight, bias, v_ref, out_ref, alpha)
        sc_ref += float(sc_t)
        assert jnp.allclose(prev_seq[t, :B, :OUT].astype(jnp.float32), prev_r,
                            atol=1e-5), f"prev mismatch at step {t}"
    assert jnp.allclose(v_state[:B, :OUT], v_ref, atol=1e-4)
    assert jnp.allclose(out_state[:B, :OUT].astype(jnp.float32), out_ref, atol=1e-5)
    assert abs(float(sc) - sc_ref) < 1e-3

    # --- per-step API (T=1 path) on fresh state ---
    v2, out2 = init_spiking_dense_state(B, OUT_pad, init_mem)
    v_r2 = jnp.full((B, OUT), init_mem, jnp.float32)
    o_r2 = jnp.zeros((B, OUT), jnp.float32)
    for t in range(2):
        prev, v2, out2, _ = spiking_dense_forward(
            x_seq[t], wt_pad, b_pad, v2, out2, alpha=alpha)
        jax.block_until_ready((prev, v2, out2))
        prev_r, v_r2, o_r2, _ = _reference_forward(
            x_seq[t], weight, bias, v_r2, o_r2, alpha)
        assert jnp.allclose(prev[:B, :OUT].astype(jnp.float32), prev_r, atol=1e-5)
        assert jnp.allclose(v2[:B, :OUT], v_r2, atol=1e-4)
        assert jnp.allclose(out2[:B, :OUT].astype(jnp.float32), o_r2, atol=1e-5)

    print("KERNEL_OK")
</pallas_src>

<mosaic_0001>
module attributes {stable_mosaic.version = 11 : i64} {
  func.func @kernel(%arg0: i32, %arg1: i32, %arg2: memref<1x16x64xbf16, #tpu.memory_space<vmem>>, %arg3: memref<64x128xf32, #tpu.memory_space<vmem>>, %arg4: memref<1x128xf32, #tpu.memory_space<vmem>>, %arg5: memref<16x128xf32, #tpu.memory_space<vmem>>, %arg6: memref<1x16x128xbf16, #tpu.memory_space<vmem>>, %arg7: memref<16x128xf32, #tpu.memory_space<vmem>>, %arg8: memref<16x128xf32, #tpu.memory_space<vmem>>) attributes {dimension_semantics = [#tpu.dimension_semantics<parallel>, #tpu.dimension_semantics<arbitrary>], iteration_bounds = array<i64: 2, 6>, scalar_prefetch = 0 : i64, scratch_operands = 1 : i64, tpu.core_type = #tpu.core_type<tc>, window_params = [{transform_indices = @transform_0, window_bounds = array<i64: 1, 16, 64>}, {transform_indices = @transform_1, window_bounds = array<i64: 64, 128>}, {transform_indices = @transform_2, window_bounds = array<i64: 1, 128>}, {transform_indices = @transform_3, window_bounds = array<i64: 16, 128>}, {transform_indices = @transform_4, window_bounds = array<i64: 1, 16, 128>}, {transform_indices = @transform_5, window_bounds = array<i64: 16, 128>}]} {
    %c0_i32 = arith.constant 0 : i32
    %0 = arith.cmpi eq, %arg1, %c0_i32 : i32
    %1 = arith.extui %0 : i1 to i32
    %c0_i32_0 = arith.constant 0 : i32
    %2 = arith.cmpi ne, %1, %c0_i32_0 : i32
    scf.if %2 {
      %c0_18 = arith.constant 0 : index
      %c0_19 = arith.constant 0 : index
      %34 = vector.load %arg5[%c0_18, %c0_19] : memref<16x128xf32, #tpu.memory_space<vmem>>, vector<16x128xf32>
      %c0_20 = arith.constant 0 : index
      %c0_21 = arith.constant 0 : index
      %35 = vector.load %arg8[%c0_20, %c0_21] : memref<16x128xf32, #tpu.memory_space<vmem>>, vector<16x128xf32>
      tpu.vector_store %arg8[%c0_20, %c0_21], %34 {strides = array<i32>} : memref<16x128xf32, #tpu.memory_space<vmem>>, vector<16x128xf32>,
    } else {
    }
    %c0 = arith.constant 0 : index
    %c0_1 = arith.constant 0 : index
    %c0_2 = arith.constant 0 : index
    %3 = vector.load %arg2[%c0, %c0_1, %c0_2] : memref<1x16x64xbf16, #tpu.memory_space<vmem>>, vector<1x16x64xbf16>
    %4 = vector.shape_cast %3 : vector<1x16x64xbf16> to vector<16x64xbf16>
    %5 = arith.extf %4 : vector<16x64xbf16> to vector<16x64xf32>
    %c0_3 = arith.constant 0 : index
    %c0_4 = arith.constant 0 : index
    %6 = vector.load %arg3[%c0_3, %c0_4] : memref<64x128xf32, #tpu.memory_space<vmem>>, vector<64x128xf32>
    %cst = arith.constant dense<0.000000e+00> : vector<16x128xf32>
    %7 = tpu.matmul %5, %6, %cst {dimension_numbers = #tpu.dot_dimension_numbers<[1], [0], [0], [1], [0, 0, 1, 1], [], []>} : vector<16x64xf32>, vector<64x128xf32>, vector<16x128xf32> -> vector<16x128xf32>
    %c0_5 = arith.constant 0 : index
    %c0_6 = arith.constant 0 : index
    %8 = vector.load %arg4[%c0_5, %c0_6] : memref<1x128xf32, #tpu.memory_space<vmem>>, vector<1x128xf32>
    %9 = vector.broadcast %8 : vector<1x128xf32> to vector<16x128xf32>
    %10 = arith.addf %7, %9 : vector<16x128xf32>
    %c0_7 = arith.constant 0 : index
    %c0_8 = arith.constant 0 : index
    %11 = vector.load %arg8[%c0_7, %c0_8] : memref<16x128xf32, #tpu.memory_space<vmem>>, vector<16x128xf32>
    %12 = arith.addf %11, %10 : vector<16x128xf32>
    %cst_9 = arith.constant 1.000000e+00 : f32
    %13 = vector.broadcast %cst_9 : f32 to vector<16x128xf32>
    %14 = arith.cmpf oge, %12, %13 : vector<16x128xf32>
    %15 = arith.extui %14 : vector<16x128xi1> to vector<16x128xi32>
    %16 = arith.sitofp %15 : vector<16x128xi32> to vector<16x128xf32>
    %cst_10 = arith.constant -1.000000e+02 : f32
    %17 = vector.broadcast %cst_10 : f32 to vector<16x128xf32>
    %18 = arith.cmpf ole, %12, %17 : vector<16x128xf32>
    %19 = arith.extui %18 : vector<16x128xi1> to vector<16x128xi32>
    %20 = arith.sitofp %19 : vector<16x128xi32> to vector<16x128xf32>
    %21 = arith.subf %12, %16 : vector<16x128xf32>
    %cst_11 = arith.constant 1.000000e+02 : f32
    %22 = vector.broadcast %cst_11 : f32 to vector<16x128xf32>
    %23 = arith.mulf %20, %22 : vector<16x128xf32>
    %24 = arith.addf %21, %23 : vector<16x128xf32>
    %c0_12 = arith.constant 0 : index
    %c0_13 = arith.constant 0 : index
    %25 = vector.load %arg8[%c0_12, %c0_13] : memref<16x128xf32, #tpu.memory_space<vmem>>, vector<16x128xf32>
    tpu.vector_store %arg8[%c0_12, %c0_13], %24 {strides = array<i32>} : memref<16x128xf32, #tpu.memory_space<vmem>>, vector<16x128xf32>,
    %26 = arith.subf %16, %20 : vector<16x128xf32>
    %27 = arith.truncf %26 : vector<16x128xf32> to vector<16x128xbf16>
    %c0_14 = arith.constant 0 : index
    %c0_15 = arith.constant 0 : index
    %c0_16 = arith.constant 0 : index
    %28 = vector.load %arg6[%c0_14, %c0_15, %c0_16] : memref<1x16x128xbf16, #tpu.memory_space<vmem>>, vector<1x16x128xbf16>
    %29 = vector.shape_cast %28 : vector<1x16x128xbf16> to vector<16x128xbf16>
    %30 = vector.shape_cast %27 : vector<16x128xbf16> to vector<1x16x128xbf16>
    tpu.vector_store %arg6[%c0_14, %c0_15, %c0_16], %30 {strides = array<i32>} : memref<1x16x128xbf16, #tpu.memory_space<vmem>>, vector<1x16x128xbf16>,
    %c5_i32 = arith.constant 5 : i32
    %31 = arith.cmpi eq, %arg1, %c5_i32 : i32
    %32 = arith.extui %31 : i1 to i32
    %c0_i32_17 = arith.constant 0 : i32
    %33 = arith.cmpi ne, %32, %c0_i32_17 : i32
    scf.if %33 {
      %c0_18 = arith.constant 0 : index
      %c0_19 = arith.constant 0 : index
      %34 = vector.load %arg8[%c0_18, %c0_19] : memref<16x128xf32, #tpu.memory_space<vmem>>, vector<16x128xf32>
      %c0_20 = arith.constant 0 : index
      %c0_21 = arith.constant 0 : index
      %35 = vector.load %arg7[%c0_20, %c0_21] : memref<16x128xf32, #tpu.memory_space<vmem>>, vector<16x128xf32>
      tpu.vector_store %arg7[%c0_20, %c0_21], %34 {strides = array<i32>} : memref<16x128xf32, #tpu.memory_space<vmem>>, vector<16x128xf32>,
    } else {
    }
    return
  }
  func.func @transform_0(%arg0: i32, %arg1: i32) -> (i32, i32, i32) {
    %c0_i32 = arith.constant 0 : i32
    %c0_i32_0 = arith.constant 0 : i32
    %c0_i32_1 = arith.constant 0 : i32
    return %arg1, %c0_i32, %c0_i32_0 : i32, i32, i32
  }
  func.func @transform_1(%arg0: i32, %arg1: i32) -> (i32, i32) {
    %c0_i32 = arith.constant 0 : i32
    %c0_i32_0 = arith.constant 0 : i32
    return %c0_i32, %arg0 : i32, i32
  }
  func.func @transform_2(%arg0: i32, %arg1: i32) -> (i32, i32) {
    %c0_i32 = arith.constant 0 : i32
    %c0_i32_0 = arith.constant 0 : i32
    return %c0_i32, %arg0 : i32, i32
  }
  func.func @transform_3(%arg0: i32, %arg1: i32) -> (i32, i32) {
    %c0_i32 = arith.constant 0 : i32
    %c0_i32_0 = arith.constant 0 : i32
    return %c0_i32, %arg0 : i32, i32
  }
  func.func @transform_4(%arg0: i32, %arg1: i32) -> (i32, i32, i32) {
    %c0_i32 = arith.constant 0 : i32
    %c0_i32_0 = arith.constant 0 : i32
    return %arg1, %c0_i32, %arg0 : i32, i32, i32
  }
  func.func @transform_5(%arg0: i32, %arg1: i32) -> (i32, i32) {
    %c0_i32 = arith.constant 0 : i32
    %c0_i32_0 = arith.constant 0 : i32
    return %c0_i32, %arg0 : i32, i32
  }
}

</mosaic_0001>

<bundles_post_ra>
// kernel: spiking_dense_forward_seq.1
= control target key start
LH: loop header
LB: loop body
LE: loop exit
PB: predicated region body
PF: predicated region fallthrough
CT: control target
= control target key end

     0   :  { %11 = vsyncpa [#allocation4], 0  ;;  %s1172_s0 = inlined_call_operand.vmem [shape: bf16[6,16,64], index: 0, kind: input, shape index: {}]   ;;  %s1173_s1 = inlined_call_operand.hbm [shape: f32[64,256], index: 1, kind: input, shape index: {}]   ;;  %s1174_s2 = inlined_call_operand.vmem [shape: f32[1,256], index: 2, kind: input, shape index: {}]   ;;  %s1175_s3 = inlined_call_operand.vmem [shape: f32[16,256], index: 3, kind: input, shape index: {}, may-alias: {3,5}]   ;;  %s1176_s4 = inlined_call_operand.vmem [shape: bf16[6,16,256], index: 4, kind: output, shape index: {0}]   ;;  %s1177_s5 = inlined_call_operand.vmem [shape: f32[16,256], index: 5, kind: output, shape index: {1}, may-alias: {3,5}]  }
   0x1   :  { %13 = vsyncpa [#allocation4 + $0x1], 0  ;;  %s971_s18 = smov 0   ;;  %s973_s19 = smov 0  }
   0x2   :  { %s975_s20 = smov 0   ;;  %s977_s21 = smov 0  }
   0x3   :  { %s979_s22 = smov 0   ;;  %s981_s23 = smov 0  }
   0x4   :  { %s983_s24 = smov 0   ;;  %s985_s25 = smov 0  }
   0x5   :  { %s987_s26 = smov 0   ;;  %s989_s27 = smov 0  }
   0x6 LB: > { %1184 = sst [smem:[#allocation9_spill]] %s903_s19  ;;  %s690_s28 = sadd.s32 4294967295, %s935_s27   ;;  %s935_s27 = sphi %s989_s27, %s19_s27   ;;  %s931_s26 = sphi %s987_s26, %s1203_s26   ;;  %s927_s25 = sphi %s985_s25, %s1202_s25   ;;  %s923_s24 = sphi %s983_s24, %s1201_s24   ;;  %s919_s23 = sphi %s981_s23, %s1200_s23   ;;  %s915_s22 = sphi %s979_s22, %s1199_s22   ;;  %s911_s21 = sphi %s977_s21, %s1205_s21   ;;  %s907_s20 = sphi %s975_s20, %s1204_s20   ;;  %s903_s19 = sphi %s973_s19, %s1197_s19   ;;  %s899_s18 = sphi %s971_s18, %s1196_s18  }
   0x7   : > { %1185 = sst [smem:[#allocation10_spill]] %s915_s22  ;;  %s28_s29 = sadd.s32 1, %s927_s25 }
   0x8   : > { %1186 = sst [smem:[#allocation11_spill]] %s927_s25  ;;  %p29_p0 = scmp.ge.s32.totalorder %s28_s29, 6 }
   0x9   : > { %1187 = sst [smem:[#allocation12_spill]] %s931_s26  ;;  %s31_s30 = sadd.s32 1, %s931_s26 }
   0xa   : > { %s64_s6 = sadd.s32 1, %s915_s22  ;;  %p71_p1 = scmp.ne.s32.totalorder %s915_s22, %s911_s21 }
   0xb   : > { %s1207_s29 = smov (%p29_p0, %s28_s29), 0  ;;  %s1209_s30 = smov (!%p29_p0, %s31_s30), %s931_s26 }
   0xc   : > { %1188 = sst [smem:[#allocation13_spill]] %s1207_s29  ;;  %p72_p2 = scmp.eq.s32.totalorder %s935_s27, 0 }
   0xd   : > { %p77_p3 = scmp.ne.s32.totalorder %s911_s21, %s907_s20  ;;  %p33_p4 = scmp.ge.s32.totalorder %s1209_s30, 2 }
   0xe   : > { %p78_p5 = scmp.eq.s32.totalorder %s690_s28, 0  ;;  %p1033_p6 = por %p72_p2, %p71_p1 }
   0xf   : > { %s139_s8 = ssub.s32 %s927_s25, %s1207_s29  ;;  %s1211_s30 = smov (%p33_p4, %s1209_s30), 0 }
  0x10   : > { %1190 = sst [smem:[#allocation14_spill]] %s1211_s30  ;;  %p1041_p7 = por %p78_p5, %p77_p3 }
  0x11   : > { %s144_s10 = sadd.s32 1, %s903_s19  ;;  %s61_s11 = ssub.s32 %s931_s26, %s1211_s30 }
  0x12   : > { %p154_p8 = scmp.ne.s32.totalorder %s903_s19, %s899_s18  ;;  %p62_p9 = scmp.eq.s32.totalorder %s61_s11, 0 }
  0x13   : > { %s141_s12 = sor.u32 %s139_s8, %s61_s11  ;;  %p155_p11 = scmp.eq.s32.totalorder %s690_s28, 11 }
  0x14   : > { %p142_p10 = scmp.eq.s32.totalorder %s141_s12, 0  ;;  %p693_p0 = scmp.ge.s32.totalorder %s935_s27, 12 }
  0x15   : > { %s1051_s13 = scalar_select %p62_p9, %s915_s22, %s64_s6  }
  0x16   : > { %s1054_s14 = scalar_select %p142_p10, %s903_s19, %s144_s10  }
  0x17   : > { %1192 = sst [smem:[#allocation15_spill]] %s1051_s13  ;;  %p1056_p12 = por %p155_p11, %p154_p8 }
  0x18   : > { %1193 = sst [smem:[#allocation16_spill]] %s1054_s14  ;;  %p1063_p13 = por %p155_p11, %p71_p1 }
  0x19   : > { %203 = sbr.rel (%p693_p0) target bundleno = 37 (0x25), region = 16  ;;  %s215_s17 = sand.u32 (!%p693_p0), 1, %s915_s22  }
  0x1a   : > { %s695_s20 = sshll.u32 (!%p693_p0), %s931_s26, 3  ;;  %s694_s28 = sshll.u32 (!%p693_p0), %s215_s17, 6 }
  0x1b   : > { %s223_s10 = scalar_lea.hbm (!%p693_p0), %s1173_s1, %s695_s20  ;;  %s219_s12 = scalar_lea.vmem (!%p693_p0), [#allocation3], %s694_s28 }
  0x1c   : > { %s224_s11 = sshll.u32 (!%p693_p0), %s223_s10, 4  ;;  %s226_s30 = sshll.u32 (!%p693_p0), %s219_s12, 4  ;;  %s225_s11 = int_to_ptr.hbm [resolvable:$true] %s224_s11  ;;  %s227_s30 = int_to_ptr.vmem [resolvable:$true] %s226_s30 }
  0x1d   : > { %s216_s29 = scalar_lea.sflag (!%p693_p0), [#allocation4], %s215_s17  ;;  %s937_s25 = smov (!%p693_p0), 256  }
  0x1e   : > { %s938_s13 = smov 128   ;;  %s939_s14 = smov 8  }
  0x1f   : > { %738 = dma.hbm_to_vmem [thread:$0]  (%p1033_p6), %s225_s11, 1024, %s227_s30, %s216_s29, %s937_s25, %s938_s13, %s939_s14  }
  0x20   : > { %241 = sbr.rel (!%p1033_p6) target bundleno = 37 (0x25), region = 32  ;;  %s696_s26 = sshll.u32 (%p1033_p6), %s215_s17, 4 }
  0x21   : > { %s247_s6 = scalar_lea.vmem (%p1033_p6), %s1175_s3, %s695_s20  ;;  %s245_s28 = scalar_lea.vmem (%p1033_p6), [#allocation5], %s696_s26 }
  0x22   : > { %v278_v0 = vld [vmem:[%s247_s6] sm:$0xff] (%p1033_p6)  ;;  %v280_v1 = vld [vmem:[%s247_s6 + $0x10] sm:$0xff] (%p1033_p6) }
  0x23   : > { %279 = vst [vmem:[%s245_s28] sm:$0xff] (%p1033_p6), %v278_v0 }
  0x24   : > { %281 = vst [vmem:[%s245_s28 + $0x8] sm:$0xff] (%p1033_p6), %v280_v1 }
  0x25 PF: > { %p698_p1 = scmp.ge.s32.totalorder %s935_s27, 1  ;;  %p286_p2 = scmp.lt.s32.totalorder %s935_s27, 13 }
  0x27   : > { %p287_p3 = pnand %p698_p1, %p286_p2 }
  0x28   : > { %s292_s25 = sand.u32 (!%p287_p3), 1, %s911_s21  }
  0x29   : > { %290 = sbr.rel (%p287_p3) target bundleno = 240 (0xf0), region = 70  ;;  %s699_s29 = sshll.u32 (!%p287_p3), %s292_s25, 6 }
  0x2a   : > { %s293_s30 = scalar_lea.sflag (!%p287_p3), [#allocation4], %s292_s25  ;;  %s1083_s19 = scalar_lea.vmem (!%p287_p3), [#allocation3], %s699_s29 }
  0x2e   : > { %894 = dma.done.wait (%p1041_p7), %s293_s30, 1024  }
  0x2f   : > { %896 = vsyncadd (%p1041_p7), %s293_s30, 4294966272  ;;  %s700_s22 = sshll.u32 %s292_s25, 4  ;;  %s337_s26 = sand.u32 1, %s899_s18  }
  0x30   : > { %s701_s7 = sshll.u32 %s337_s26, 3  ;;  %p346_p4 = scmp.lt.s32.totalorder %s919_s23, 5 }
  0x31   : > { %p351_p5 = scmp.lt.s32.totalorder %s923_s24, 1  ;;  %s305_s6 = scalar_lea.vmem [#allocation5], %s700_s22 }
  0x32   : > { %s347_s13 = scalar_select %p346_p4, %s919_s23, 5 }
  0x33   : > { %s1094_s14 = scalar_select %p351_p5, %s923_s24, 1 }
  0x34   : > { %s720_s17 = sshll.u32 %s347_s13, 3  ;;  %s1103_s28 = scalar_lea.vmem [#allocation6], %s701_s7 }
  0x35   : > { %s350_s9 = scalar_lea.vmem %s1172_s0, %s720_s17  ;;  %s353_s12 = scalar_lea.vmem %s1174_s2, %s1094_s14 }
  0x36   : > { %s1105_s18 = scalar_lea.vmem [#allocation7], %s700_s22  ;;  %p705_p6 = scmp.ne.s32.totalorder %s919_s23, 0 }
  0x38   : > { %357 = sbr.rel (%p705_p6) target bundleno = 64 (0x40), region = 82 }
  0x3d   : > { %v358_v2 = vld [vmem:[%s305_s6] sm:$0xff]  ;;  %v359_v3 = vld [vmem:[%s305_s6 + $0x8] sm:$0xff] }
  0x3e   : > { %360 = vst [vmem:[#allocation2] sm:$0xff] %v358_v2 }
  0x3f   : > { %361 = vst [vmem:[#allocation2 + $0x8] sm:$0xff] %v359_v3 }
  0x40 PF: > { %v373_v4 = vld [vmem:[%s1083_s19 + $0x38] sm:$0xff]  ;;  %v372_v5 = vld [vmem:[%s1083_s19 + $0x30] sm:$0xff]  ;;  %v371_v6 = vld [vmem:[%s1083_s19 + $0x28] sm:$0xff]  ;;  %vm378_vm0 = vcmask 523264   ;;  %v940_v24 = vmov 0.0   ;;  %p712_p7 = scmp.ne.s32.totalorder %s919_s23, 5 }
  0x41   : > { %393 = vmatpush.msra.mxu0 %v373_v4  ;;  %730 = vmatpush.msra.mxu1 %v373_v4  ;;  %v370_v7 = vld [vmem:[%s1083_s19 + $0x20] sm:$0xff]  ;;  %v369_v8 = vld [vmem:[%s1083_s19 + $0x18] sm:$0xff]  ;;  %v368_v9 = vld [vmem:[%s1083_s19 + $0x10] sm:$0xff] }
  0x42   : > { %v722_v10 = vld [vmem:[%s350_s9] sm:$0xff]   ;;  %v367_v11 = vld [vmem:[%s1083_s19 + $0x8] sm:$0xff]  ;;  %v366_v12 = vld [vmem:[%s1083_s19] sm:$0xff] }
  0x43   : > { %394 = vmatpush.msra.mxu0 %v372_v5  ;;  %731 = vmatpush.msra.mxu1 %v372_v5  ;;  %v723_v13 = vunpack.c.l.bf16 %v722_v10  ;;  %v724_v14 = vunpack.c.h.bf16 %v722_v10  ;;  %v824_v15 = vld [vmem:[%s353_s12] ss:$0 sm:$0xff] }
  0x45   : > { %395 = vmatpush.msra.mxu0 %v371_v6  ;;  %732 = vmatpush.msra.mxu1 %v371_v6  ;;  %v408_v17 = vld [vmem:[#allocation2] sm:$0xff] }
  0x46   : > { %v409_v19 = vld [vmem:[#allocation2 + $0x8] sm:$0xff] }
  0x47   : > { %396 = vmatpush.msra.mxu0 %v370_v7  ;;  %733 = vmatpush.msra.mxu1 %v370_v7 }
  0x49   : > { %397 = vmatpush.msra.mxu0 %v369_v8  ;;  %734 = vmatpush.msra.mxu1 %v369_v8 }
  0x4b   : > { %398 = vmatpush.msra.mxu0 %v368_v9  ;;  %735 = vmatpush.msra.mxu1 %v368_v9 }
  0x4d   : > { %399 = vmatpush.msra.mxu0 %v367_v11  ;;  %736 = vmatpush.msra.mxu1 %v367_v11 }
  0x4f   : > { %400 = vmatpush.msra.mxu0 %v366_v12  ;;  %737 = vmatpush.msra.mxu1 %v366_v12 }
  0x50   : > { %706 = vmatmul.msk.f32.vlgmr.msra.gmra.mxu0 %vm378_vm0, %v723_v13  ;;  %707 = vmatmul.msk.f32.vlgmr.msra.gmra.mxu1 %vm378_vm0, %v724_v14 }
  0xcd   : > { %v402_v16 = vpop.f32.mrf.mxu0  ;;  %v405_v18 = vpop.f32.mrf.mxu1 }
  0xce   : > { %v403_v20 = vadd.f32 %v824_v15, %v402_v16  ;;  %v406_v21 = vadd.f32 %v824_v15, %v405_v18 }
  0xd0   : > { %v410_v22 = vadd.f32 %v408_v17, %v403_v20  ;;  %v411_v23 = vadd.f32 %v409_v19, %v406_v21 }
  0xd2   : > { %vm412_vm1 = vcmp.ge.f32.partialorder %v410_v22, 1.0  ;;  %vm418_vm2 = vcmp.le.f32.partialorder %v410_v22, -100.0  ;;  %vm413_vm3 = vcmp.ge.f32.partialorder %v411_v23, 1.0  ;;  %vm419_vm4 = vcmp.le.f32.partialorder %v411_v23, -100.0 }
  0xd3   : > { %v708_v25 = vsel %vm412_vm1, 1.0, %v940_v24  ;;  %v710_v26 = vsel %vm418_vm2, 1.0, %v940_v24  ;;  %v709_v27 = vsel %vm413_vm3, 1.0, %v940_v24  ;;  %v711_v28 = vsel %vm419_vm4, 1.0, %v940_v24 }
  0xd4   : > { %v424_v29 = vsub.f32 %v410_v22, %v708_v25  ;;  %v426_v30 = vmul.f32 100.0, %v710_v26  ;;  %v432_v31 = vsub.f32 %v708_v25, %v710_v26  ;;  %v425_v32 = vsub.f32 %v411_v23, %v709_v27 }
  0xd5   : > { %v427_v33 = vmul.f32 100.0, %v711_v28  ;;  %v433_v34 = vsub.f32 %v709_v27, %v711_v28 }
  0xd6   : > { %v428_v35 = vadd.f32 %v426_v30, %v424_v29  ;;  %441 = sbr.rel (%p712_p7) target bundleno = 226 (0xe2), region = 86 }
  0xd7   : > { %v429_v36 = vadd.f32 %v427_v33, %v425_v32  ;;  %v728_v37 = vpack.c.bf16 %v433_v34, %v432_v31 }
  0xd8   : > { %430 = vst [vmem:[#allocation2] sm:$0xff] %v428_v35 }
  0xd9   : > { %431 = vst [vmem:[#allocation2 + $0x8] sm:$0xff] %v429_v36 }
  0xda   : > { %729 = vst [vmem:[%s1103_s28] sm:$0xff] %v728_v37  }
  0xdf   : > { %v442_v38 = vld [vmem:[#allocation2] sm:$0xff] }
  0xe0   : > { %v443_v39 = vld [vmem:[#allocation2 + $0x8] sm:$0xff]  ;;  %444 = vst [vmem:[%s1105_s18] sm:$0xff] %v442_v38 }
  0xe1   : > { %445 = vst [vmem:[%s1105_s18 + $0x8] sm:$0xff] %v443_v39 }
  0xe2 PF: > { %456 = sbr.rel (!%p1056_p12) target bundleno = 235 (0xeb), region = 90  ;;  %s715_s30 = sshll.u32 (%p1056_p12), %s919_s23, 2 }
  0xe3   : > { %s458_s19 = sadd.s32 (%p1056_p12), %s923_s24, %s715_s30 }
  0xe4   : > { %s716_s22 = sshll.u32 (%p1056_p12), %s458_s19, 2 }
  0xe5   : > { %s460_s13 = scalar_lea.vmem (%p1056_p12), %s1176_s4, %s716_s22 }
  0xe8   : > { %v477_v40 = vld [vmem:[%s1103_s28] sm:$0xf]  ;;  %v479_v41 = vld [vmem:[%s1103_s28 + $0x4] sm:$0xf] }
  0xe9   : > { %478 = vst [vmem:[%s460_s13] sm:$0xf] %v477_v40 }
  0xea   : > { %480 = vst [vmem:[%s460_s13 + $0x8] sm:$0xf] %v479_v41 }
  0xeb PF: > { %508 = sbr.rel (!%p1063_p13) target bundleno = 240 (0xf0), region = 131  ;;  %s717_s15 = sshll.u32 (%p1063_p13), %s923_s24, 3  ;;  %v541_v42 = vld [vmem:[%s1105_s18] sm:$0xff] (%p1063_p13) }
  0xec   : > { %v543_v43 = vld [vmem:[%s1105_s18 + $0x8] sm:$0xff] (%p1063_p13)  ;;  %s510_s17 = scalar_lea.vmem (%p1063_p13), %s1177_s5, %s717_s15 }
  0xed   : > { %542 = vst [vmem:[%s510_s17] sm:$0xff] (%p1063_p13), %v541_v42 }
  0xee   : > { %544 = vst [vmem:[%s510_s17 + $0x10] sm:$0xff] (%p1063_p13), %v543_v43 }
  0xf0 PF: > { %s19_s27 = sadd.s32 1, %s935_s27   ;;  %s1196_s18 = sld [smem:[#allocation9_spill]] }
  0xf1   : > { %p16_p8 = scmp.ge.s32.totalorder %s19_s27, 14   ;;  %s1197_s19 = sld [smem:[#allocation16_spill]] }
  0xf2   : > { %s1198_s16 = sld [smem:[#allocation10_spill]]  ;;  %s1204_s20 = smov %s911_s21 }
  0xf3   : > { %s1199_s22 = sld [smem:[#allocation15_spill]] }
  0xf4   : > { %s1200_s23 = sld [smem:[#allocation11_spill]]  ;;  %18 = sbr.rel (!%p16_p8) target bundleno = 6 (0x6), region = 227 }
  0xf5   : > { %s1201_s24 = sld [smem:[#allocation12_spill]] }
  0xf6   : > { %s1202_s25 = sld [smem:[#allocation13_spill]] }
  0xf7   : > { %s1203_s26 = sld [smem:[#allocation14_spill]] }
  0xf8   : > { %s1205_s21 = smov %s1198_s16 }
  0xf9   :  { %567 = vsyncpa [#allocation4], 1 }
  0xfa   :  { %569 = vsyncpa [#allocation4 + $0x1], 1 }

</bundles_post_ra>
